<compile_context>
chip_gen: v6e
topology: v6e:2x2x1
jax: 0.10.0
libtpu: 0.0.40
codegen_flags: <defaults>
</compile_context>

<pallas_src>
import functools

import jax
import jax.numpy as jnp
from jax import lax
from jax.experimental import pallas as pl
from jax.experimental.pallas import tpu as pltpu


def bigram_kernel(idx_sref, flag_sref, tgt_ref, table_ref, logits_ref, loss_ref):
    tile_n, V = logits_ref.shape
    step = pl.program_id(0)
    base = step * tile_n

    # ---- Embedding lookup: row gather from the VMEM-resident table ----------
    # idx values are scalar-prefetched into SMEM and drive dynamic sublane
    # slices of the resident table; each row goes straight into the lane-dense
    # logits output block (no HBM re-read, no DMA descriptors per row).
    # TODO(synk): out-of-range idx is not bounds-checked here (VMEM reads have
    # no runtime check), unlike PyTorch nn.Embedding which raises.
    def gather_row(r, carry):
        row_idx = idx_sref[base + r]
        logits_ref[pl.ds(r, 1), :] = table_ref[pl.ds(row_idx, 1), :]
        return carry

    lax.fori_loop(0, tile_n, gather_row, 0)

    # ---- Cross-entropy: per-tile partial SUM (flag-gated) -------------------
    loss_ref[0, 0] = 0.0   # deterministic output on the targets=None path

    @pl.when(flag_sref[0] != 0)
    def _():
        logits = logits_ref[...].astype(jnp.float32)               # (tile_n, V)
        tgt = tgt_ref[...]                                         # (tile_n, 1)
        cols = lax.broadcasted_iota(jnp.int32, (tile_n, V), 1)
        m = jnp.max(logits, axis=-1, keepdims=True)
        lse = m + jnp.log(jnp.sum(jnp.exp(logits - m), axis=-1, keepdims=True))
        # target pick via compare+select (no second one-hot / MXU pass)
        tgt_logit = jnp.sum(jnp.where(cols == tgt, logits, 0.0),
                            axis=-1, keepdims=True)
        loss_ref[0, 0] = jnp.sum(lse - tgt_logit)


def _choose_tile_n(n):
    """Largest row tile <= 1024 that divides n (big tiles amortize step cost)."""
    for t in (1024, 512, 256, 128, 64, 32, 16, 8):
        if n % t == 0:
            return t
    return n  # full-array block (always a legal block shape)


@functools.partial(jax.jit, static_argnames=("tile_n",))
def _bigram_pallas(idx_flat, flag, tgt_col, table, *, tile_n):
    N = idx_flat.shape[0]
    V = table.shape[1]
    num_tiles = N // tile_n

    # bytes: table once + logits writeback + idx/targets + partial sums
    cost = pl.CostEstimate(
        flops=6 * N * V,
        transcendentals=N * V + N,
        bytes_accessed=V * V * 4 + N * V * 4 + 2 * N * 4 + num_tiles * 4,
    )

    # resident table + double-buffered logits/targets tiles + headroom,
    # clamped to v7x's 64 MiB physical VMEM, never below the 32 MiB default.
    need = V * V * 4 + 2 * tile_n * V * 4 + 2 * tile_n * 4 + (1 << 20)
    vmem_limit = int(min(64 * 1024 * 1024, max(32 * 1024 * 1024, need)))

    grid_spec = pltpu.PrefetchScalarGridSpec(
        num_scalar_prefetch=2,                 # idx (N,), flag (1,) -> SMEM
        grid=(num_tiles,),
        in_specs=[
            # targets, (tile_n, 1) blocks over the row axis
            pl.BlockSpec((tile_n, 1), lambda i, idx_ref, flag_ref: (i, 0)),
            # embedding table: VMEM-resident, fetched once (constant index_map)
            pl.BlockSpec((V, V), lambda i, idx_ref, flag_ref: (0, 0)),
        ],
        out_specs=(
            # lane-dense logits tile (last dim V is a multiple of 128)
            pl.BlockSpec((tile_n, V), lambda i, idx_ref, flag_ref: (i, 0)),
            # per-tile CE partial sums in SMEM (reduced outside the kernel)
            pl.BlockSpec((1, 1), lambda i, idx_ref, flag_ref: (i, 0),
                         memory_space=pltpu.SMEM),
        ),
    )

    logits, part = pl.pallas_call(
        bigram_kernel,
        out_shape=(
            jax.ShapeDtypeStruct((N, V), jnp.float32),
            jax.ShapeDtypeStruct((num_tiles, 1), jnp.float32),
        ),
        grid_spec=grid_spec,
        # row-tile axis is independent -> shard across TensorCores on v7x
        compiler_params=pltpu.CompilerParams(
            dimension_semantics=("parallel",),
            vmem_limit_bytes=vmem_limit),
        cost_estimate=cost,
    )(idx_flat, flag, tgt_col, table)

    loss = jnp.sum(part) / N
    return logits, loss


class BigramLanguageModel:
    """JAX/Pallas port of the PyTorch BigramLanguageModel forward pass."""
    # TODO(synk): generate() (host-side autoregressive multinomial sampling
    # loop) is not ported; only the forward pass is implemented as a kernel.

    def __init__(self, vocab_size, key):
        self.vocab_size = vocab_size
        # nn.Embedding default init: N(0, 1)
        self.token_embedding_table = jax.random.normal(
            key, (vocab_size, vocab_size), dtype=jnp.float32)

    def forward(self, idx, targets=None):
        B, T = idx.shape
        V = self.vocab_size
        N = B * T
        idx_flat = idx.reshape(N).astype(jnp.int32)
        if targets is None:
            tgt_col = jnp.zeros((N, 1), dtype=jnp.int32)   # unused (flag = 0)
            flag = jnp.zeros((1,), dtype=jnp.int32)        # skip CE in-kernel
        else:
            tgt_col = targets.reshape(N, 1).astype(jnp.int32)
            flag = jnp.ones((1,), dtype=jnp.int32)

        logits, loss = _bigram_pallas(idx_flat, flag, tgt_col,
                                      self.token_embedding_table,
                                      tile_n=_choose_tile_n(N))

        if targets is None:
            # Matches PyTorch: logits stay (B, T, C), loss is None.
            return logits.reshape(B, T, V), None
        # Matches PyTorch: logits were view-ed to (B*T, C) before returning.
        return logits, loss


def _reference(table, idx, targets):
    """Pure-JAX reference for verification."""
    B, T = idx.shape
    V = table.shape[1]
    logits = table[idx]                                   # (B, T, V)
    lf = logits.reshape(B * T, V)
    tf = targets.reshape(B * T)
    lse = jax.nn.logsumexp(lf, axis=-1)
    loss = jnp.mean(lse - lf[jnp.arange(B * T), tf])
    return lf, loss


if __name__ == "__main__":
    vocab_size = 128   # multiple of 128 -> lane-dense logits
    B, T = 2, 8

    key = jax.random.PRNGKey(0)
    k_table, k_idx, k_tgt = jax.random.split(key, 3)

    model = BigramLanguageModel(vocab_size, k_table)

    idx = jax.random.randint(k_idx, (B, T), 0, vocab_size, dtype=jnp.int32)
    targets = jax.random.randint(k_tgt, (B, T), 0, vocab_size, dtype=jnp.int32)

    logits, loss = model.forward(idx, targets)
    logits = jax.block_until_ready(logits)
    loss = jax.block_until_ready(loss)

    # sanity check against pure-JAX reference
    ref_logits, ref_loss = _reference(model.token_embedding_table, idx, targets)
    assert logits.shape == (B * T, vocab_size)
    assert jnp.allclose(logits, ref_logits, atol=1e-5, rtol=1e-5)
    assert jnp.allclose(loss, ref_loss, atol=1e-5, rtol=1e-5)

    # also exercise the targets=None (inference) path
    logits_only, none_loss = model.forward(idx, None)
    jax.block_until_ready(logits_only)
    assert logits_only.shape == (B, T, vocab_size)
    assert jnp.allclose(logits_only.reshape(B * T, vocab_size), ref_logits,
                        atol=1e-5, rtol=1e-5)
    assert none_loss is None

    print("KERNEL_OK")
</pallas_src>

<mosaic_0001>
module attributes {stable_mosaic.version = 11 : i64} {
  func.func @bigram_kernel(%arg0: i32, %arg1: memref<16xi32, #tpu.memory_space<smem>>, %arg2: memref<1xi32, #tpu.memory_space<smem>>, %arg3: memref<16x1xi32, #tpu.memory_space<vmem>>, %arg4: memref<128x128xf32, #tpu.memory_space<vmem>>, %arg5: memref<16x128xf32, #tpu.memory_space<vmem>>, %arg6: memref<1x1xf32, #tpu.memory_space<smem>>) attributes {dimension_semantics = [#tpu.dimension_semantics<parallel>], iteration_bounds = array<i64: 1>, scalar_prefetch = 2 : i64, scratch_operands = 0 : i64, tpu.core_type = #tpu.core_type<tc>, window_params = [{transform_indices = @transform_0, window_bounds = array<i64: 16, 1>}, {pipeline_mode = #tpu.pipeline_mode<synchronous>, transform_indices = @transform_1, window_bounds = array<i64: 128, 128>}, {transform_indices = @transform_2, window_bounds = array<i64: 16, 128>}, {transform_indices = @transform_3, window_bounds = array<i64: 1, 1>}]} {
    %c16_i32 = arith.constant 16 : i32
    %0 = arith.muli %arg0, %c16_i32 : i32
    %c0_i32 = arith.constant 0 : i32
    %c16_i32_0 = arith.constant 16 : i32
    %1 = arith.addi %c0_i32, %c16_i32_0 : i32
    %c1_i32 = arith.constant 1 : i32
    scf.for %arg7 = %c0_i32 to %1 step %c1_i32  : i32 {
      %7 = arith.addi %0, %arg7 : i32
      %8 = arith.index_cast %7 : i32 to index
      %9 = memref.load %arg1[%8] : memref<16xi32, #tpu.memory_space<smem>>
      %10 = arith.index_cast %9 : i32 to index
      %c0_6 = arith.constant 0 : index
      %11 = vector.load %arg4[%10, %c0_6] : memref<128x128xf32, #tpu.memory_space<vmem>>, vector<1x128xf32>
      %12 = arith.index_cast %arg7 : i32 to index
      %c0_7 = arith.constant 0 : index
      %13 = vector.load %arg5[%12, %c0_7] : memref<16x128xf32, #tpu.memory_space<vmem>>, vector<1x128xf32>
      tpu.vector_store %arg5[%12, %c0_7], %11 {strides = array<i32>} : memref<16x128xf32, #tpu.memory_space<vmem>>, vector<1x128xf32>,
    }
    %c16_i32_1 = arith.constant 16 : i32
    %cst = arith.constant 0.000000e+00 : f32
    %c0 = arith.constant 0 : index
    %c0_2 = arith.constant 0 : index
    %2 = memref.load %arg6[%c0, %c0_2] : memref<1x1xf32, #tpu.memory_space<smem>>
    memref.store %cst, %arg6[%c0, %c0_2] : memref<1x1xf32, #tpu.memory_space<smem>>
    %c0_3 = arith.constant 0 : index
    %3 = memref.load %arg2[%c0_3] : memref<1xi32, #tpu.memory_space<smem>>
    %c0_i32_4 = arith.constant 0 : i32
    %4 = arith.cmpi ne, %3, %c0_i32_4 : i32
    %5 = arith.extui %4 : i1 to i32
    %c0_i32_5 = arith.constant 0 : i32
    %6 = arith.cmpi ne, %5, %c0_i32_5 : i32
    scf.if %6 {
      %c0_6 = arith.constant 0 : index
      %c0_7 = arith.constant 0 : index
      %7 = vector.load %arg5[%c0_6, %c0_7] : memref<16x128xf32, #tpu.memory_space<vmem>>, vector<16x128xf32>
      %c0_8 = arith.constant 0 : index
      %c0_9 = arith.constant 0 : index
      %8 = vector.load %arg3[%c0_8, %c0_9] : memref<16x1xi32, #tpu.memory_space<vmem>>, vector<16x1xi32>
      %9 = tpu.iota {dimensions = array<i32: 1>} : vector<16x128xi32>
      %cst_10 = arith.constant dense<0xFF800000> : vector<16xf32>
      %10 = vector.multi_reduction <maximumf>, %7, %cst_10 [1] : vector<16x128xf32> to vector<16xf32>
      %11 = vector.shape_cast %10 : vector<16xf32> to vector<16x1xf32>
      %12 = vector.broadcast %11 : vector<16x1xf32> to vector<16x128xf32>
      %13 = arith.subf %7, %12 : vector<16x128xf32>
      %14 = math.exp %13 : vector<16x128xf32>
      %cst_11 = arith.constant dense<0.000000e+00> : vector<16xf32>
      %15 = vector.multi_reduction <add>, %14, %cst_11 [1] : vector<16x128xf32> to vector<16xf32>
      %16 = vector.shape_cast %15 : vector<16xf32> to vector<16x1xf32>
      %17 = math.log %16 : vector<16x1xf32>
      %18 = arith.addf %11, %17 : vector<16x1xf32>
      %19 = vector.broadcast %8 : vector<16x1xi32> to vector<16x128xi32>
      %20 = arith.cmpi eq, %9, %19 : vector<16x128xi32>
      %cst_12 = arith.constant 0.000000e+00 : f32
      %21 = vector.broadcast %cst_12 : f32 to vector<16x128xf32>
      %22 = arith.select %20, %7, %21 : vector<16x128xi1>, vector<16x128xf32>
      %cst_13 = arith.constant dense<0.000000e+00> : vector<16xf32>
      %23 = vector.multi_reduction <add>, %22, %cst_13 [1] : vector<16x128xf32> to vector<16xf32>
      %24 = vector.shape_cast %23 : vector<16xf32> to vector<16x1xf32>
      %25 = arith.subf %18, %24 : vector<16x1xf32>
      %26 = vector.shape_cast %25 : vector<16x1xf32> to vector<1x16x1xf32>
      %cst_14 = arith.constant dense<0.000000e+00> : vector<1xf32>
      %27 = vector.multi_reduction <add>, %26, %cst_14 [1, 2] : vector<1x16x1xf32> to vector<1xf32>
      %28 = vector.shape_cast %27 : vector<1xf32> to vector<1x1x1xf32>
      %29 = vector.extract %28[0, 0, 0] : f32 from vector<1x1x1xf32>
      %c0_15 = arith.constant 0 : index
      %c0_16 = arith.constant 0 : index
      %30 = memref.load %arg6[%c0_15, %c0_16] : memref<1x1xf32, #tpu.memory_space<smem>>
      memref.store %29, %arg6[%c0_15, %c0_16] : memref<1x1xf32, #tpu.memory_space<smem>>
    } else {
    }
    return
  }
  func.func @transform_0(%arg0: i32, %arg1: memref<16xi32, #tpu.memory_space<smem>>, %arg2: memref<1xi32, #tpu.memory_space<smem>>) -> (i32, i32) {
    %c0_i32 = arith.constant 0 : i32
    %c0_i32_0 = arith.constant 0 : i32
    return %arg0, %c0_i32 : i32, i32
  }
  func.func @transform_1(%arg0: i32, %arg1: memref<16xi32, #tpu.memory_space<smem>>, %arg2: memref<1xi32, #tpu.memory_space<smem>>) -> (i32, i32) {
    %c0_i32 = arith.constant 0 : i32
    %c0_i32_0 = arith.constant 0 : i32
    %c0_i32_1 = arith.constant 0 : i32
    return %c0_i32, %c0_i32_0 : i32, i32
  }
  func.func @transform_2(%arg0: i32, %arg1: memref<16xi32, #tpu.memory_space<smem>>, %arg2: memref<1xi32, #tpu.memory_space<smem>>) -> (i32, i32) {
    %c0_i32 = arith.constant 0 : i32
    %c0_i32_0 = arith.constant 0 : i32
    return %arg0, %c0_i32 : i32, i32
  }
  func.func @transform_3(%arg0: i32, %arg1: memref<16xi32, #tpu.memory_space<smem>>, %arg2: memref<1xi32, #tpu.memory_space<smem>>) -> (i32, i32) {
    %c0_i32 = arith.constant 0 : i32
    %c0_i32_0 = arith.constant 0 : i32
    return %arg0, %c0_i32 : i32, i32
  }
}

</mosaic_0001>

<bundles_post_ra>
// kernel: _bigram_pallas.1
= control target key start
LH: loop header
LB: loop body
LE: loop exit
PB: predicated region body
PF: predicated region fallthrough
CT: control target
= control target key end

     0   :  { %s321_s0 = inlined_call_operand.vmem [shape: s32[16], index: 0, kind: input, shape index: {}]   ;;  %s322_s1 = inlined_call_operand.<no memory space> [shape: s32[1], index: 1, kind: input, shape index: {}]   ;;  %s323_s2 = inlined_call_operand.vmem [shape: s32[16,1], index: 2, kind: input, shape index: {}]   ;;  %s324_s3 = inlined_call_operand.hbm [shape: f32[128,128], index: 3, kind: input, shape index: {}]   ;;  %s325_s4 = inlined_call_operand.hbm [shape: f32[16,128], index: 4, kind: output, shape index: {0}]   ;;  %s326_s5 = inlined_call_operand.hbm [shape: f32[1,1], index: 5, kind: output, shape index: {1}]  }
   0x1   :  { %s11_s20 = sshll.u32 %s321_s0, 4  ;;  %15 = sst [smem:[#allocation4]] %s322_s1  ;;  %s12_s20 = int_to_ptr.vmem [resolvable:$true] %s11_s20 }
   0x2   :  { %s180_s23 = scalar_lea.vmem %s12_s20, 16  ;;  %p185_p1 = scmp.lt.s32.totalorder %s12_s20, %s12_s20 }
   0x3   :  { %p181_p0 = scmp.ne.s32.totalorder %s12_s20, %s180_s23  ;;  %p186_p2 = scmp.lt.s32.totalorder %s180_s23, %s180_s23 }
   0x5   :  { %p187_p3 = por %p186_p2, %p185_p1 }
   0x7   :  { %p188_p4 = pnand %p187_p3, %p181_p0 }
   0x9   :  { %191 = shalt.err (!%p188_p4)  }
   0xa   :  { %s256_s24 = smov [#allocation3]  }
   0xb   :  { %14 = dma.vmem_to_smem %s12_s20, 16, %s256_s24, [#allocation2] }
   0xc   :  { %244 = dma.done.wait [#allocation2], 16 }
   0xd   :  { %245 = vsyncadd [#allocation2], 4294967280 }
   0xe   :  { %17 = sfence }
   0xf   :  { %18 = vsyncpa [#allocation6], 0 }
  0x10   :  { %19 = vsyncpa [#allocation7], 0 }
  0x11   :  { %20 = vsyncpa [#allocation8], 0  ;;  %s257_s0 = smov [#allocation5]  }
  0x12   :  { %s28_s25 = sshll.u32 %s257_s0, 4  ;;  %s29_s25 = int_to_ptr.vmem [resolvable:$true] %s28_s25 }
  0x13   :  { %s200_s1 = scalar_lea.vmem %s29_s25, 2048  ;;  %p205_p6 = scmp.lt.s32.totalorder %s29_s25, %s29_s25 }
  0x14   :  { %p201_p5 = scmp.ne.s32.totalorder %s29_s25, %s200_s1  ;;  %p206_p7 = scmp.lt.s32.totalorder %s200_s1, %s200_s1 }
  0x16   :  { %p207_p8 = por %p206_p7, %p205_p6 }
  0x18   :  { %p208_p9 = pnand %p207_p8, %p201_p5 }
  0x1a   :  { %211 = shalt.err (!%p208_p9)
}
  0x1b   :  { %s258_s26 = smov 128   ;;  %s259_s27 = smov 8  }
  0x1c   :  { %34 = dma.hbm_to_vmem [thread:$0]  %s324_s3, 2048, %s29_s25, [#allocation6], %s258_s26, %s258_s26, %s259_s27  }
  0x1d   :  { %246 = dma.done.wait [#allocation6], 2048  }
  0x1e   :  { %247 = vsyncadd [#allocation6], 4294965248  ;;  %s252_s30 = smov 0  }
  0x1f LB: > { %s46_s6 = sld [smem:[#allocation3 + %s254_s30]]  ;;  %s49_s8 = scalar_lea.vmem [#allocation9], %s254_s30  ;;  %s254_s30 = sphi %s252_s30, %s44_s30  }
  0x20   : > { %s44_s30 = sadd.s32 1, %s254_s30  }
  0x21   : > { %p41_p10 = scmp.ge.s32.totalorder %s44_s30, 16  }
  0x22   :  { %s53_s9 = sld [smem:[#allocation4]] (%p41_p10)  ;;  %s260_s10 = smov (%p41_p10), 0.0  }
  0x23   :  { %43 = sbr.rel (!%p41_p10) target bundleno = 31 (0x1f), region = 54  ;;  %52 = sst [smem:[#allocation10]] (%p41_p10), %s260_s10 }
  0x25   : > { %s47_s7 = scalar_lea.vmem [#allocation5], %s46_s6 }
  0x26   : > { %v48_v0 = vld [vmem:[%s47_s7] sm:$0x1] }
  0x27   : > { %50 = vst [vmem:[%s49_s8] sm:$0x1] %v48_v0 }
  0x28   :  { %p151_p11 = scmp.eq.s32.totalorder %s53_s9, 0 }
  0x2a   :  { %57 = sbr.rel (%p151_p11) target bundleno = 570 (0x23a), region = 24 }
  0x2f   :  { %v58_v1 = vld [vmem:[#allocation9] sm:$0xff]  ;;  %v261_v3 = vmov 0   ;;  %v59_v4 = vld [vmem:[#allocation9 + $0x8] sm:$0xff]  ;;  %v62_v12 = vlaneseq  ;;  %vm100_vm2 = vcmask 7168  }
  0x30   :  { %v60_v2 = vld [vmem:[%s323_s2] sm:$0xff]  ;;  %64 = vmax.xlane.f32.xlu0 %v58_v1  ;;  %170 = vset.pattern.permute.xlu1 %v261_v3  ;;  %v61_v5 = vld [vmem:[%s323_s2 + $0x8] sm:$0xff] }
  0x31   :  { %85 = vperm.xlu1 %170, %v60_v2   ;;  %171 = vset.pattern.permute.xlu0 %v261_v3  ;;  %v63_v14 = vand.u32 127, %v62_v12 }
  0x34   :  { %66 = vmax.xlane.f32.xlu0 %v59_v4 }
  0x35   :  { %88 = vperm.xlu1 %170, %v61_v5  }
  0xac   :  { %v86_v13 = vpop.permute.xlu1 %85 }
  0xad   :  { %vm90_vm0 = vcmp.eq.s32.totalorder %v63_v14, %v86_v13 }
  0xae   :  { %v92_v17 = vsel %vm90_vm0, %v58_v1, 0.0 }
  0xb0   :  { %v89_v16 = vpop.permute.xlu1 %88 }
  0xb1   :  { %vm91_vm1 = vcmp.eq.s32.totalorder %v63_v14, %v89_v16 }
  0xb2   :  { %v93_v19 = vsel %vm91_vm1, %v59_v4, 0.0 }
  0xb9   :  { %v65_v6 = vpop.xlane.xlu0 %64 }
  0xba   :  { %v68_v7 = vsub.f32 %v58_v1, %v65_v6 }
  0xbc   :  { %v70_v8 = vmul.f32 1.442695, %v68_v7 }
  0xbd   :  { %v67_v9 = vpop.xlane.xlu0 %66 }
  0xbe   :  { %172 = vpow2.f32 %v70_v8  ;;  %v69_v10 = vsub.f32 %v59_v4, %v67_v9 }
  0xc0   :  { %v72_v11 = vmul.f32 1.442695, %v69_v10 }
  0xc2   :  { %174 = vpow2.f32 %v72_v11 }
  0xcb   :  { %v173_v15 = vpop.eup %172 }
  0xcc   :  { %74 = vadd.xlane.f32.xlu0 %v173_v15 }
  0xcf   :  { %v175_v18 = vpop.eup %174 }
  0xd0   :  { %76 = vadd.xlane.f32.xlu1 %v175_v18  ;;  %94 = vadd.xlane.f32.xlu0 %v92_v17 }
  0xd4   :  { %96 = vadd.xlane.f32.xlu0 %v93_v19 }
 0x155   :  { %v75_v20 = vpop.xlane.xlu0 %74 }
 0x156   :  { %176 = vlog2.f32 %v75_v20 }
 0x159   :  { %v77_v21 = vpop.xlane.xlu1 %76  ;;  %v95_v24 = vpop.xlane.xlu0 %94 }
 0x15a   :  { %178 = vlog2.f32 %v77_v21 }
 0x15d   :  { %v97_v30 = vpop.xlane.xlu0 %96 }
 0x163   :  { %v177_v22 = vpop.eup %176 }
 0x164   :  { %v79_v23 = vmul.f32 0.6931472, %v177_v22 }
 0x166   :  { %v82_v25 = vadd.f32 %v79_v23, %v65_v6 }
 0x167   :  { %v179_v26 = vpop.eup %178 }
 0x168   :  { %v81_v27 = vmul.f32 0.6931472, %v179_v26  ;;  %v98_v28 = vsub.f32 %v82_v25, %v95_v24 }
 0x16a   :  { %v83_v29 = vadd.f32 %v81_v27, %v67_v9  ;;  %v101_v32 = vsel %vm100_vm2, %v98_v28, 0.0 }
 0x16c   :  { %v99_v31 = vsub.f32 %v83_v29, %v97_v30 }
 0x16e   :  { %v102_v33 = vsel %vm100_vm2, %v99_v31, 0.0 }
 0x16f   :  { %v103_v34 = vadd.f32 %v102_v33, %v101_v32 }
 0x171   :  { %104 = vadd.xlane.f32.xlu0 %v103_v34 }
 0x1fa   :  { %v105_v35 = vpop.xlane.xlu0 %104 }
 0x1fb   :  { %v106_v36 = vrot.slane %v105_v35, 4 }
 0x1fd   :  { %v107_v37 = vadd.f32 %v106_v36, %v105_v35 }
 0x1ff   :  { %v108_v38 = vrot.slane %v107_v37, 2 }
 0x201   :  { %v109_v39 = vadd.f32 %v108_v38, %v107_v37 }
 0x203   :  { %v110_v40 = vrot.slane %v109_v39, 1 }
 0x205   :  { %v111_v41 = vadd.f32 %v110_v40, %v109_v39 }
 0x207   :  { %152 = vpush %v111_v41 }
 0x238   :  { %s153_s2 = spop %152 }
 0x239   :  { %113 = sst [smem:[#allocation10]] %s153_s2 }
 0x23a PF:  { %s262_s14 = smov [#allocation9]  }
 0x23b   :  { %s119_s15 = sshll.u32 %s262_s14, 4  ;;  %s120_s15 = int_to_ptr.vmem [resolvable:$true] %s119_s15 }
 0x23c   :  { %s212_s16 = scalar_lea.vmem %s120_s15, 256  ;;  %p217_p13 = scmp.lt.s32.totalorder %s120_s15, %s120_s15 }
 0x23d   :  { %p213_p12 = scmp.ne.s32.totalorder %s120_s15, %s212_s16  ;;  %p218_p0 = scmp.lt.s32.totalorder %s212_s16, %s212_s16 }
 0x23f   :  { %p219_p1 = por %p218_p0, %p217_p13 }
 0x241   :  { %p220_p2 = pnand %p219_p1, %p213_p12 }
 0x243   :  { %223 = shalt.err (!%p220_p2)
}
 0x244   :  { %125 = dma.vmem_to_hbm [thread:$0]  %s120_s15, 256, %s325_s4, [#allocation7], %s258_s26, %s258_s26, %s259_s27  }
 0x245   :  { %s263_s19 = smov [#allocation10]  }
 0x246   :  { %133 = dma.smem_to_hbm %s263_s19, 16, %s326_s5, [#allocation8]  }
 0x247   :  { %248 = dma.done.wait [#allocation7], 256  }
 0x248   :  { %249 = vsyncadd [#allocation7], 4294967040 }
 0x249   :  { %250 = dma.done.wait [#allocation8], 16  }
 0x24a   :  { %251 = vsyncadd [#allocation8], 4294967280 }
 0x24b   :  { %140 = sfence }
 0x24c   :  { %141 = vsyncpa [#allocation6], 1 }
 0x24d   :  { %142 = vsyncpa [#allocation7], 1 }
 0x24e   :  { %143 = vsyncpa [#allocation8], 1 }

</bundles_post_ra>
